<compile_context>
chip_gen: v5e
topology: v5e:2x2
jax: 0.10.0
libtpu: 0.0.40
codegen_flags: <defaults>
</compile_context>

<pallas_src>
import jax
import jax.numpy as jnp
from jax.experimental import pallas as pl
from jax.experimental.pallas import tpu as pltpu


# ---------------------------------------------------------------------------
# Pallas kernel: pairwise quantities between GT boxes and anchors / predictions
# ---------------------------------------------------------------------------
def _atss_pair_kernel(gt_ref, anc_ref, pd_ref,
                      ov_ref, dist_ref, ingts_ref, ioupd_ref, argm_ref):
    # gt_ref : (1, M, 8)   per-GT features: x1,y1,x2,y2,cx,cy,area,clipped-area
    # anc_ref: (4, TA)     anchor coords (coord-first) for this anchor tile
    # pd_ref : (1, 4, TA)  predicted boxes (coord-first) for this batch/tile
    gt = gt_ref[0]                                   # (M, 8)
    gx1 = gt[:, 0:1]
    gy1 = gt[:, 1:2]
    gx2 = gt[:, 2:3]
    gy2 = gt[:, 3:4]
    gcx = gt[:, 4:5]
    gcy = gt[:, 5:6]
    area_g = gt[:, 6:7]                              # (x2-x1)*(y2-y1)
    area_g_clip = gt[:, 7:8]                         # clip(x2-x1,0)*clip(y2-y1,0)

    anc = anc_ref[...]                               # (4, TA)
    ax1 = anc[0:1, :]
    ay1 = anc[1:2, :]
    ax2 = anc[2:3, :]
    ay2 = anc[3:4, :]                                # (1, TA)

    # ---- IoU(gt, anchors)  (bbox_overlaps, mode='iou', eps=1e-6) ----
    area_a = (ax2 - ax1) * (ay2 - ay1)               # (1, TA)
    lt_x = jnp.maximum(gx1, ax1)
    lt_y = jnp.maximum(gy1, ay1)
    rb_x = jnp.minimum(gx2, ax2)
    rb_y = jnp.minimum(gy2, ay2)
    w = jnp.maximum(rb_x - lt_x, 0.0)
    h = jnp.maximum(rb_y - lt_y, 0.0)
    overlap = w * h                                  # (M, TA)
    union = jnp.maximum(area_g + area_a - overlap, 1e-6)
    ov = overlap / union
    ov_ref[0] = ov

    # ---- fused M-axis argmax of overlaps (first-max index, like argmax) ----
    row = jax.lax.broadcasted_iota(jnp.int32, ov.shape, 0).astype(jnp.float32)
    ov_max = jnp.max(ov, axis=0, keepdims=True)      # (1, TA)
    first_max = jnp.min(jnp.where(ov == ov_max, row, jnp.float32(1e9)),
                        axis=0, keepdims=True)       # (1, TA)
    argm_ref[0] = first_max.astype(jnp.int32)

    # ---- squared center distances (sqrt dropped; same top-k ordering) ----
    acx = (ax1 + ax2) * 0.5
    acy = (ay1 + ay2) * 0.5
    dx = gcx - acx
    dy = gcy - acy
    dist_ref[0] = dx * dx + dy * dy

    # ---- anchor centers inside gt boxes (select_candidates_in_gts, eps=1e-9) ----
    d_min = jnp.minimum(jnp.minimum(acx - gx1, acy - gy1),
                        jnp.minimum(gx2 - acx, gy2 - acy))
    ingts_ref[0] = (d_min > 1e-9).astype(jnp.float32).astype(jnp.int8)

    # ---- IoU(gt, predicted boxes) (iou_calculator, eps=1e-9) ----
    pd = pd_ref[0]                                   # (4, TA)
    px1 = pd[0:1, :]
    py1 = pd[1:2, :]
    px2 = pd[2:3, :]
    py2 = pd[3:4, :]
    ix1 = jnp.maximum(gx1, px1)
    iy1 = jnp.maximum(gy1, py1)
    ix2 = jnp.minimum(gx2, px2)
    iy2 = jnp.minimum(gy2, py2)
    ovl = jnp.maximum(ix2 - ix1, 0.0) * jnp.maximum(iy2 - iy1, 0.0)
    a2 = jnp.maximum(px2 - px1, 0.0) * jnp.maximum(py2 - py1, 0.0)
    ioupd_ref[0] = ovl / (area_g_clip + a2 - ovl + 1e-9)


def _choose_anchor_tile(n_anchors, n_max_boxes, bs, *,
                        max_tile=2048, vmem_budget_bytes=24 << 20):
    """Pick the anchor (lane) tile: as large as possible within a VMEM budget
    sized against v7x (64 MiB physical / 32 MiB scoped), capped at 2048, while
    keeping >= 2 grid instances so both v7x TensorCores get work."""
    # bytes resident per anchor column (double-buffered input + output blocks)
    out_bytes = n_max_boxes * (4 + 4 + 1 + 4) + 4      # 3x f32 + i8 maps + i32 argmax
    in_bytes = 2 * 4 * 4                               # anc + pd, coord-first f32
    per_anchor = 2 * (out_bytes + in_bytes)
    cap = max(128, (vmem_budget_bytes // per_anchor) // 128 * 128)

    a_ceil = -(-n_anchors // 128) * 128                # anchors rounded up to lane width
    tile = min(max_tile, cap, a_ceil)
    tile = max(128, (tile // 128) * 128)
    while bs * (-(-a_ceil // tile)) < 2 and tile > 128:
        tile = max(128, (tile // 2 // 128) * 128)
    return tile


def _atss_pairwise(gt_bboxes, anc_bboxes, pd_bboxes):
    """Returns overlaps [B,M,A] f32, squared distances [B,M,A] f32,
    is_in_gts [B,M,A] int8, iou(gt,pred) [B,M,A] f32, overlaps-argmax-over-M [B,A] i32."""
    bs, n_max_boxes, _ = gt_bboxes.shape
    n_anchors = anc_bboxes.shape[0]

    gt = gt_bboxes.astype(jnp.float32)                     # (B, M, 4)
    gx1, gy1, gx2, gy2 = gt[..., 0], gt[..., 1], gt[..., 2], gt[..., 3]
    gt_feat = jnp.stack([
        gx1, gy1, gx2, gy2,
        (gx1 + gx2) * 0.5, (gy1 + gy2) * 0.5,
        (gx2 - gx1) * (gy2 - gy1),
        jnp.maximum(gx2 - gx1, 0.0) * jnp.maximum(gy2 - gy1, 0.0),
    ], axis=-1)                                            # (B, M, 8)

    tile = _choose_anchor_tile(n_anchors, n_max_boxes, bs)
    a_pad = -(-n_anchors // tile) * tile

    anc_t = anc_bboxes.astype(jnp.float32).T               # (4, A) coord-first
    pd_t = jnp.transpose(pd_bboxes.astype(jnp.float32), (0, 2, 1))  # (B, 4, A)
    if a_pad != n_anchors:
        anc_t = jnp.pad(anc_t, ((0, 0), (0, a_pad - n_anchors)))
        pd_t = jnp.pad(pd_t, ((0, 0), (0, 0), (0, a_pad - n_anchors)))

    grid = (bs, a_pad // tile)
    bma_block = pl.BlockSpec((1, n_max_boxes, tile), lambda b, a: (b, 0, a))
    argm_block = pl.BlockSpec((1, 1, tile), lambda b, a: (b, 0, a))

    out_shapes = (
        jax.ShapeDtypeStruct((bs, n_max_boxes, a_pad), jnp.float32),  # overlaps
        jax.ShapeDtypeStruct((bs, n_max_boxes, a_pad), jnp.float32),  # squared dist
        jax.ShapeDtypeStruct((bs, n_max_boxes, a_pad), jnp.int8),     # is_in_gts
        jax.ShapeDtypeStruct((bs, n_max_boxes, a_pad), jnp.float32),  # iou(gt, pred)
        jax.ShapeDtypeStruct((bs, 1, a_pad), jnp.int32),              # argmax over M
    )

    # explicit VMEM budget: double-buffered blocks + headroom (v7x-safe)
    block_bytes = (n_max_boxes * tile * (4 + 4 + 1 + 4) + tile * 4
                   + 2 * 4 * tile * 4 + n_max_boxes * 8 * 4)
    vmem_limit = int(min(max(4 * block_bytes + (4 << 20), 16 << 20), 64 << 20))

    outs = pl.pallas_call(
        _atss_pair_kernel,
        out_shape=out_shapes,
        grid_spec=pltpu.PrefetchScalarGridSpec(
            num_scalar_prefetch=0,
            grid=grid,
            in_specs=[
                pl.BlockSpec((1, n_max_boxes, 8), lambda b, a: (b, 0, 0)),
                pl.BlockSpec((4, tile), lambda b, a: (0, a)),
                pl.BlockSpec((1, 4, tile), lambda b, a: (b, 0, a)),
            ],
            out_specs=[bma_block, bma_block, bma_block, bma_block, argm_block],
        ),
        compiler_params=pltpu.CompilerParams(
            dimension_semantics=("parallel", "parallel"),
            vmem_limit_bytes=vmem_limit),
    )(gt_feat, anc_t, pd_t)

    ov, dist_sq, ingts, ioupd, argm = outs
    # strip anchor padding (no-op slices when n_anchors is already tile-aligned)
    return (ov[:, :, :n_anchors], dist_sq[:, :, :n_anchors],
            ingts[:, :, :n_anchors], ioupd[:, :, :n_anchors],
            argm[:, 0, :n_anchors])


# ---------------------------------------------------------------------------
# Plain-JAX glue replicating ATSSAssigner.forward semantics
# ---------------------------------------------------------------------------
def _select_topk_candidates(distances, n_level_bboxes, mask_gt, topk):
    bs, M, _ = distances.shape
    mask_gt_topk = jnp.tile(mask_gt, (1, 1, topk)).astype(bool)   # (B, M, topk)
    is_in_candidate_list = []
    candidate_idxs = []
    start = 0
    for nb in n_level_bboxes:
        end = start + nb
        lvl_dist = distances[:, :, start:end]
        selected_k = min(topk, nb)
        _, idxs = jax.lax.top_k(-lvl_dist, selected_k)            # smallest distances
        candidate_idxs.append(idxs + start)
        idxs_masked = jnp.where(mask_gt_topk[..., :selected_k], idxs, 0)
        oh = jax.nn.one_hot(idxs_masked, nb, dtype=jnp.int32).sum(axis=-2)
        oh = jnp.where(oh > 1, 0, oh)
        is_in_candidate_list.append(oh.astype(distances.dtype))
        start = end
    return (jnp.concatenate(is_in_candidate_list, axis=-1),
            jnp.concatenate(candidate_idxs, axis=-1))


def _thres_calculator(is_in_candidate, candidate_idxs, overlaps):
    bs, M, A = overlaps.shape
    cand_ov_masked = jnp.where(is_in_candidate > 0, overlaps,
                               jnp.zeros_like(overlaps))
    c_idx = candidate_idxs.reshape(bs * M, -1)
    assist = (A * jnp.arange(bs * M, dtype=c_idx.dtype))[:, None]
    flat_idx = c_idx + assist
    cand_ov = cand_ov_masked.reshape(-1)[flat_idx].reshape(bs, M, -1)
    mean = cand_ov.mean(axis=-1, keepdims=True)
    std = jnp.std(cand_ov, axis=-1, keepdims=True, ddof=1)  # torch.std: unbiased
    return mean + std, cand_ov_masked


def _select_highest_overlaps(mask_pos, overlaps_argmax, n_max_boxes):
    # applied unconditionally; identical to the torch path when no anchor has >1 gt
    fg_mask = mask_pos.sum(axis=-2)
    mask_multi = jnp.tile(fg_mask[:, None, :] > 1, (1, n_max_boxes, 1))
    is_max = jax.nn.one_hot(overlaps_argmax, n_max_boxes, dtype=mask_pos.dtype)
    is_max = jnp.transpose(is_max, (0, 2, 1))                          # (B, M, A)
    mask_pos = jnp.where(mask_multi, is_max, mask_pos)
    fg_mask = mask_pos.sum(axis=-2)
    target_gt_idx = jnp.argmax(mask_pos, axis=-2)
    return target_gt_idx, fg_mask, mask_pos


def _get_targets(gt_labels, gt_bboxes, target_gt_idx, fg_mask, num_classes):
    bs, n_max_boxes = gt_bboxes.shape[:2]
    n_anchors = target_gt_idx.shape[-1]
    bg_idx = num_classes
    batch_idx = jnp.arange(bs, dtype=target_gt_idx.dtype)[:, None]
    idx = (target_gt_idx + batch_idx * n_max_boxes).reshape(-1)
    t_labels = gt_labels.reshape(-1)[idx].reshape(bs, n_anchors)
    t_labels = jnp.where(fg_mask > 0, t_labels,
                         jnp.full_like(t_labels, bg_idx))
    t_bboxes = gt_bboxes.reshape(-1, 4)[idx].reshape(bs, n_anchors, 4)
    t_scores = jax.nn.one_hot(t_labels, num_classes + 1,
                              dtype=jnp.float32)[:, :, :num_classes]
    return t_labels, t_bboxes, t_scores


def atss_assigner_forward(anc_bboxes, n_level_bboxes, gt_labels, gt_bboxes,
                          mask_gt, pd_bboxes, *, topk=9, num_classes=20):
    bs, n_max_boxes, _ = gt_bboxes.shape
    n_anchors = anc_bboxes.shape[0]

    if n_max_boxes == 0:   # reference early-exit path
        return (jnp.full((bs, n_anchors), num_classes, jnp.int32),
                jnp.zeros((bs, n_anchors, 4), jnp.float32),
                jnp.zeros((bs, n_anchors, num_classes), jnp.float32),
                jnp.zeros((bs, n_anchors), bool))

    # ---- Pallas hot path: all pairwise [B, M, A] maps + fused M-axis argmax ----
    overlaps, dist_sq, is_in_gts, iou_pd, ov_argmax = _atss_pairwise(
        gt_bboxes, anc_bboxes, pd_bboxes)

    # ---- ATSS candidate selection / thresholding (glue) ----
    is_in_candidate, candidate_idxs = _select_topk_candidates(
        dist_sq, n_level_bboxes, mask_gt, topk)
    overlaps_thr, iou_candidates = _thres_calculator(
        is_in_candidate, candidate_idxs, overlaps)

    is_pos = jnp.where(iou_candidates > overlaps_thr,
                       is_in_candidate, jnp.zeros_like(is_in_candidate))
    mask_pos = (is_pos * is_in_gts.astype(is_pos.dtype)
                * mask_gt.astype(is_pos.dtype))

    target_gt_idx, fg_mask, mask_pos = _select_highest_overlaps(
        mask_pos, ov_argmax, n_max_boxes)

    target_labels, target_bboxes, target_scores = _get_targets(
        gt_labels, gt_bboxes, target_gt_idx, fg_mask, num_classes)

    # ---- rescale scores by IoU with predicted boxes ----
    ious = iou_pd * mask_pos
    ious = ious.max(axis=-2)[..., None]
    target_scores = target_scores * ious

    return (target_labels.astype(jnp.int32), target_bboxes,
            target_scores, fg_mask.astype(bool))


# ---------------------------------------------------------------------------
# Demo
# ---------------------------------------------------------------------------
def _make_boxes(key, shape_prefix):
    kc, ks = jax.random.split(key)
    c = jax.random.uniform(kc, shape_prefix + (2,), minval=5.0, maxval=60.0)
    wh = jax.random.uniform(ks, shape_prefix + (2,), minval=2.0, maxval=12.0)
    return jnp.concatenate([c - wh / 2.0, c + wh / 2.0], axis=-1)


if __name__ == "__main__":
    bs = 2
    n_max_boxes = 8
    n_anchors = 256
    n_level_bboxes = [128, 96, 32]   # each level >= topk
    topk = 9
    num_classes = 20

    key = jax.random.PRNGKey(0)
    k_anc, k_gt, k_pd, k_lab = jax.random.split(key, 4)

    anc_bboxes = _make_boxes(k_anc, (n_anchors,))                # (A, 4)
    gt_bboxes = _make_boxes(k_gt, (bs, n_max_boxes))             # (B, M, 4)
    pd_bboxes = _make_boxes(k_pd, (bs, n_anchors))               # (B, A, 4)
    gt_labels = jax.random.randint(k_lab, (bs, n_max_boxes, 1), 0, num_classes)
    # first 6 gt boxes valid, last 2 padded
    mask_gt = jnp.concatenate(
        [jnp.ones((bs, 6, 1), jnp.float32), jnp.zeros((bs, 2, 1), jnp.float32)],
        axis=1)

    out = atss_assigner_forward(
        anc_bboxes, n_level_bboxes, gt_labels, gt_bboxes, mask_gt, pd_bboxes,
        topk=topk, num_classes=num_classes)
    out = jax.block_until_ready(out)

    t_labels, t_bboxes, t_scores, fg_mask = out
    assert t_labels.shape == (bs, n_anchors)
    assert t_bboxes.shape == (bs, n_anchors, 4)
    assert t_scores.shape == (bs, n_anchors, num_classes)
    assert fg_mask.shape == (bs, n_anchors)
    print("KERNEL_OK")
</pallas_src>

<mosaic_0001>
module attributes {stable_mosaic.version = 11 : i64} {
  func.func @_atss_pair_kernel(%arg0: i32, %arg1: i32, %arg2: memref<1x8x8xf32, #tpu.memory_space<vmem>>, %arg3: memref<4x256xf32, #tpu.memory_space<vmem>>, %arg4: memref<1x4x256xf32, #tpu.memory_space<vmem>>, %arg5: memref<1x8x256xf32, #tpu.memory_space<vmem>>, %arg6: memref<1x8x256xf32, #tpu.memory_space<vmem>>, %arg7: memref<1x8x256xi8, #tpu.memory_space<vmem>>, %arg8: memref<1x8x256xf32, #tpu.memory_space<vmem>>, %arg9: memref<1x1x256xi32, #tpu.memory_space<vmem>>) attributes {dimension_semantics = [#tpu.dimension_semantics<parallel>, #tpu.dimension_semantics<parallel>], iteration_bounds = array<i64: 2, 1>, scalar_prefetch = 0 : i64, scratch_operands = 0 : i64, tpu.core_type = #tpu.core_type<tc>, window_params = [{transform_indices = @transform_0, window_bounds = array<i64: 1, 8, 8>}, {transform_indices = @transform_1, window_bounds = array<i64: 4, 256>}, {transform_indices = @transform_2, window_bounds = array<i64: 1, 4, 256>}, {transform_indices = @transform_3, window_bounds = array<i64: 1, 8, 256>}, {transform_indices = @transform_4, window_bounds = array<i64: 1, 8, 256>}, {transform_indices = @transform_5, window_bounds = array<i64: 1, 8, 256>}, {transform_indices = @transform_6, window_bounds = array<i64: 1, 8, 256>}, {transform_indices = @transform_7, window_bounds = array<i64: 1, 1, 256>}]} {
    %c0 = arith.constant 0 : index
    %c0_0 = arith.constant 0 : index
    %c0_1 = arith.constant 0 : index
    %0 = vector.load %arg2[%c0, %c0_0, %c0_1] : memref<1x8x8xf32, #tpu.memory_space<vmem>>, vector<1x8x8xf32>
    %1 = vector.shape_cast %0 : vector<1x8x8xf32> to vector<8x8xf32>
    %2 = vector.extract_strided_slice %1 {offsets = [0, 0], sizes = [8, 1], strides = [1, 1]} : vector<8x8xf32> to vector<8x1xf32>
    %3 = vector.extract_strided_slice %1 {offsets = [0, 1], sizes = [8, 1], strides = [1, 1]} : vector<8x8xf32> to vector<8x1xf32>
    %4 = vector.extract_strided_slice %1 {offsets = [0, 2], sizes = [8, 1], strides = [1, 1]} : vector<8x8xf32> to vector<8x1xf32>
    %5 = vector.extract_strided_slice %1 {offsets = [0, 3], sizes = [8, 1], strides = [1, 1]} : vector<8x8xf32> to vector<8x1xf32>
    %6 = vector.extract_strided_slice %1 {offsets = [0, 4], sizes = [8, 1], strides = [1, 1]} : vector<8x8xf32> to vector<8x1xf32>
    %7 = vector.extract_strided_slice %1 {offsets = [0, 5], sizes = [8, 1], strides = [1, 1]} : vector<8x8xf32> to vector<8x1xf32>
    %8 = vector.extract_strided_slice %1 {offsets = [0, 6], sizes = [8, 1], strides = [1, 1]} : vector<8x8xf32> to vector<8x1xf32>
    %9 = vector.extract_strided_slice %1 {offsets = [0, 7], sizes = [8, 1], strides = [1, 1]} : vector<8x8xf32> to vector<8x1xf32>
    %c0_2 = arith.constant 0 : index
    %c0_3 = arith.constant 0 : index
    %10 = vector.load %arg3[%c0_2, %c0_3] : memref<4x256xf32, #tpu.memory_space<vmem>>, vector<4x256xf32>
    %11 = vector.extract_strided_slice %10 {offsets = [0, 0], sizes = [1, 256], strides = [1, 1]} : vector<4x256xf32> to vector<1x256xf32>
    %12 = vector.extract_strided_slice %10 {offsets = [1, 0], sizes = [1, 256], strides = [1, 1]} : vector<4x256xf32> to vector<1x256xf32>
    %13 = vector.extract_strided_slice %10 {offsets = [2, 0], sizes = [1, 256], strides = [1, 1]} : vector<4x256xf32> to vector<1x256xf32>
    %14 = vector.extract_strided_slice %10 {offsets = [3, 0], sizes = [1, 256], strides = [1, 1]} : vector<4x256xf32> to vector<1x256xf32>
    %15 = arith.subf %13, %11 : vector<1x256xf32>
    %16 = arith.subf %14, %12 : vector<1x256xf32>
    %17 = arith.mulf %15, %16 : vector<1x256xf32>
    %18 = vector.broadcast %2 : vector<8x1xf32> to vector<8x256xf32>
    %19 = vector.broadcast %11 : vector<1x256xf32> to vector<8x256xf32>
    %20 = arith.maximumf %18, %19 : vector<8x256xf32>
    %21 = vector.broadcast %3 : vector<8x1xf32> to vector<8x256xf32>
    %22 = vector.broadcast %12 : vector<1x256xf32> to vector<8x256xf32>
    %23 = arith.maximumf %21, %22 : vector<8x256xf32>
    %24 = vector.broadcast %4 : vector<8x1xf32> to vector<8x256xf32>
    %25 = vector.broadcast %13 : vector<1x256xf32> to vector<8x256xf32>
    %26 = arith.minimumf %24, %25 : vector<8x256xf32>
    %27 = vector.broadcast %5 : vector<8x1xf32> to vector<8x256xf32>
    %28 = vector.broadcast %14 : vector<1x256xf32> to vector<8x256xf32>
    %29 = arith.minimumf %27, %28 : vector<8x256xf32>
    %30 = arith.subf %26, %20 : vector<8x256xf32>
    %cst = arith.constant 0.000000e+00 : f32
    %31 = vector.broadcast %cst : f32 to vector<8x256xf32>
    %32 = arith.maximumf %30, %31 : vector<8x256xf32>
    %33 = arith.subf %29, %23 : vector<8x256xf32>
    %cst_4 = arith.constant 0.000000e+00 : f32
    %34 = vector.broadcast %cst_4 : f32 to vector<8x256xf32>
    %35 = arith.maximumf %33, %34 : vector<8x256xf32>
    %36 = arith.mulf %32, %35 : vector<8x256xf32>
    %37 = vector.broadcast %8 : vector<8x1xf32> to vector<8x256xf32>
    %38 = vector.broadcast %17 : vector<1x256xf32> to vector<8x256xf32>
    %39 = arith.addf %37, %38 : vector<8x256xf32>
    %40 = arith.subf %39, %36 : vector<8x256xf32>
    %cst_5 = arith.constant 9.99999997E-7 : f32
    %41 = vector.broadcast %cst_5 : f32 to vector<8x256xf32>
    %42 = arith.maximumf %40, %41 : vector<8x256xf32>
    %43 = arith.divf %36, %42 : vector<8x256xf32>
    %c0_6 = arith.constant 0 : index
    %c0_7 = arith.constant 0 : index
    %c0_8 = arith.constant 0 : index
    %44 = vector.load %arg5[%c0_6, %c0_7, %c0_8] : memref<1x8x256xf32, #tpu.memory_space<vmem>>, vector<1x8x256xf32>
    %45 = vector.shape_cast %44 : vector<1x8x256xf32> to vector<8x256xf32>
    %46 = vector.shape_cast %43 : vector<8x256xf32> to vector<1x8x256xf32>
    tpu.vector_store %arg5[%c0_6, %c0_7, %c0_8], %46 {strides = array<i32>} : memref<1x8x256xf32, #tpu.memory_space<vmem>>, vector<1x8x256xf32>,
    %47 = tpu.iota {dimensions = array<i32: 0>} : vector<8x256xi32>
    %48 = arith.sitofp %47 : vector<8x256xi32> to vector<8x256xf32>
    %cst_9 = arith.constant dense<0xFF800000> : vector<256xf32>
    %49 = vector.multi_reduction <maximumf>, %43, %cst_9 [0] : vector<8x256xf32> to vector<256xf32>
    %50 = vector.shape_cast %49 : vector<256xf32> to vector<1x256xf32>
    %51 = vector.broadcast %50 : vector<1x256xf32> to vector<8x256xf32>
    %52 = arith.cmpf oeq, %43, %51 : vector<8x256xf32>
    %cst_10 = arith.constant 1.000000e+09 : f32
    %53 = vector.broadcast %cst_10 : f32 to vector<8x256xf32>
    %54 = arith.select %52, %48, %53 : vector<8x256xi1>, vector<8x256xf32>
    %cst_11 = arith.constant dense<0x7F800000> : vector<256xf32>
    %55 = vector.multi_reduction <minimumf>, %54, %cst_11 [0] : vector<8x256xf32> to vector<256xf32>
    %56 = vector.shape_cast %55 : vector<256xf32> to vector<1x256xf32>
    %57 = arith.fptosi %56 : vector<1x256xf32> to vector<1x256xi32>
    %c0_12 = arith.constant 0 : index
    %c0_13 = arith.constant 0 : index
    %c0_14 = arith.constant 0 : index
    %58 = vector.load %arg9[%c0_12, %c0_13, %c0_14] : memref<1x1x256xi32, #tpu.memory_space<vmem>>, vector<1x1x256xi32>
    %59 = vector.shape_cast %58 : vector<1x1x256xi32> to vector<1x256xi32>
    %60 = vector.shape_cast %57 : vector<1x256xi32> to vector<1x1x256xi32>
    tpu.vector_store %arg9[%c0_12, %c0_13, %c0_14], %60 {strides = array<i32>} : memref<1x1x256xi32, #tpu.memory_space<vmem>>, vector<1x1x256xi32>,
    %61 = arith.addf %11, %13 : vector<1x256xf32>
    %cst_15 = arith.constant 5.000000e-01 : f32
    %62 = vector.broadcast %cst_15 : f32 to vector<1x256xf32>
    %63 = arith.mulf %61, %62 : vector<1x256xf32>
    %64 = arith.addf %12, %14 : vector<1x256xf32>
    %cst_16 = arith.constant 5.000000e-01 : f32
    %65 = vector.broadcast %cst_16 : f32 to vector<1x256xf32>
    %66 = arith.mulf %64, %65 : vector<1x256xf32>
    %67 = vector.broadcast %6 : vector<8x1xf32> to vector<8x256xf32>
    %68 = vector.broadcast %63 : vector<1x256xf32> to vector<8x256xf32>
    %69 = arith.subf %67, %68 : vector<8x256xf32>
    %70 = vector.broadcast %7 : vector<8x1xf32> to vector<8x256xf32>
    %71 = vector.broadcast %66 : vector<1x256xf32> to vector<8x256xf32>
    %72 = arith.subf %70, %71 : vector<8x256xf32>
    %73 = arith.mulf %69, %69 : vector<8x256xf32>
    %74 = arith.mulf %72, %72 : vector<8x256xf32>
    %75 = arith.addf %73, %74 : vector<8x256xf32>
    %c0_17 = arith.constant 0 : index
    %c0_18 = arith.constant 0 : index
    %c0_19 = arith.constant 0 : index
    %76 = vector.load %arg6[%c0_17, %c0_18, %c0_19] : memref<1x8x256xf32, #tpu.memory_space<vmem>>, vector<1x8x256xf32>
    %77 = vector.shape_cast %76 : vector<1x8x256xf32> to vector<8x256xf32>
    %78 = vector.shape_cast %75 : vector<8x256xf32> to vector<1x8x256xf32>
    tpu.vector_store %arg6[%c0_17, %c0_18, %c0_19], %78 {strides = array<i32>} : memref<1x8x256xf32, #tpu.memory_space<vmem>>, vector<1x8x256xf32>,
    %79 = vector.broadcast %63 : vector<1x256xf32> to vector<8x256xf32>
    %80 = vector.broadcast %2 : vector<8x1xf32> to vector<8x256xf32>
    %81 = arith.subf %79, %80 : vector<8x256xf32>
    %82 = vector.broadcast %66 : vector<1x256xf32> to vector<8x256xf32>
    %83 = vector.broadcast %3 : vector<8x1xf32> to vector<8x256xf32>
    %84 = arith.subf %82, %83 : vector<8x256xf32>
    %85 = arith.minimumf %81, %84 : vector<8x256xf32>
    %86 = vector.broadcast %4 : vector<8x1xf32> to vector<8x256xf32>
    %87 = vector.broadcast %63 : vector<1x256xf32> to vector<8x256xf32>
    %88 = arith.subf %86, %87 : vector<8x256xf32>
    %89 = vector.broadcast %5 : vector<8x1xf32> to vector<8x256xf32>
    %90 = vector.broadcast %66 : vector<1x256xf32> to vector<8x256xf32>
    %91 = arith.subf %89, %90 : vector<8x256xf32>
    %92 = arith.minimumf %88, %91 : vector<8x256xf32>
    %93 = arith.minimumf %85, %92 : vector<8x256xf32>
    %cst_20 = arith.constant 9.99999971E-10 : f32
    %94 = vector.broadcast %cst_20 : f32 to vector<8x256xf32>
    %95 = arith.cmpf ogt, %93, %94 : vector<8x256xf32>
    %96 = arith.extui %95 : vector<8x256xi1> to vector<8x256xi32>
    %97 = arith.sitofp %96 : vector<8x256xi32> to vector<8x256xf32>
    %98 = arith.fptosi %97 : vector<8x256xf32> to vector<8x256xi8>
    %c0_21 = arith.constant 0 : index
    %c0_22 = arith.constant 0 : index
    %c0_23 = arith.constant 0 : index
    %99 = vector.load %arg7[%c0_21, %c0_22, %c0_23] : memref<1x8x256xi8, #tpu.memory_space<vmem>>, vector<1x8x256xi8>
    %100 = vector.shape_cast %99 : vector<1x8x256xi8> to vector<8x256xi8>
    %101 = vector.shape_cast %98 : vector<8x256xi8> to vector<1x8x256xi8>
    tpu.vector_store %arg7[%c0_21, %c0_22, %c0_23], %101 {strides = array<i32>} : memref<1x8x256xi8, #tpu.memory_space<vmem>>, vector<1x8x256xi8>,
    %c0_24 = arith.constant 0 : index
    %c0_25 = arith.constant 0 : index
    %c0_26 = arith.constant 0 : index
    %102 = vector.load %arg4[%c0_24, %c0_25, %c0_26] : memref<1x4x256xf32, #tpu.memory_space<vmem>>, vector<1x4x256xf32>
    %103 = vector.shape_cast %102 : vector<1x4x256xf32> to vector<4x256xf32>
    %104 = vector.extract_strided_slice %103 {offsets = [0, 0], sizes = [1, 256], strides = [1, 1]} : vector<4x256xf32> to vector<1x256xf32>
    %105 = vector.extract_strided_slice %103 {offsets = [1, 0], sizes = [1, 256], strides = [1, 1]} : vector<4x256xf32> to vector<1x256xf32>
    %106 = vector.extract_strided_slice %103 {offsets = [2, 0], sizes = [1, 256], strides = [1, 1]} : vector<4x256xf32> to vector<1x256xf32>
    %107 = vector.extract_strided_slice %103 {offsets = [3, 0], sizes = [1, 256], strides = [1, 1]} : vector<4x256xf32> to vector<1x256xf32>
    %108 = vector.broadcast %2 : vector<8x1xf32> to vector<8x256xf32>
    %109 = vector.broadcast %104 : vector<1x256xf32> to vector<8x256xf32>
    %110 = arith.maximumf %108, %109 : vector<8x256xf32>
    %111 = vector.broadcast %3 : vector<8x1xf32> to vector<8x256xf32>
    %112 = vector.broadcast %105 : vector<1x256xf32> to vector<8x256xf32>
    %113 = arith.maximumf %111, %112 : vector<8x256xf32>
    %114 = vector.broadcast %4 : vector<8x1xf32> to vector<8x256xf32>
    %115 = vector.broadcast %106 : vector<1x256xf32> to vector<8x256xf32>
    %116 = arith.minimumf %114, %115 : vector<8x256xf32>
    %117 = vector.broadcast %5 : vector<8x1xf32> to vector<8x256xf32>
    %118 = vector.broadcast %107 : vector<1x256xf32> to vector<8x256xf32>
    %119 = arith.minimumf %117, %118 : vector<8x256xf32>
    %120 = arith.subf %116, %110 : vector<8x256xf32>
    %cst_27 = arith.constant 0.000000e+00 : f32
    %121 = vector.broadcast %cst_27 : f32 to vector<8x256xf32>
    %122 = arith.maximumf %120, %121 : vector<8x256xf32>
    %123 = arith.subf %119, %113 : vector<8x256xf32>
    %cst_28 = arith.constant 0.000000e+00 : f32
    %124 = vector.broadcast %cst_28 : f32 to vector<8x256xf32>
    %125 = arith.maximumf %123, %124 : vector<8x256xf32>
    %126 = arith.mulf %122, %125 : vector<8x256xf32>
    %127 = arith.subf %106, %104 : vector<1x256xf32>
    %cst_29 = arith.constant 0.000000e+00 : f32
    %128 = vector.broadcast %cst_29 : f32 to vector<1x256xf32>
    %129 = arith.maximumf %127, %128 : vector<1x256xf32>
    %130 = arith.subf %107, %105 : vector<1x256xf32>
    %cst_30 = arith.constant 0.000000e+00 : f32
    %131 = vector.broadcast %cst_30 : f32 to vector<1x256xf32>
    %132 = arith.maximumf %130, %131 : vector<1x256xf32>
    %133 = arith.mulf %129, %132 : vector<1x256xf32>
    %134 = vector.broadcast %9 : vector<8x1xf32> to vector<8x256xf32>
    %135 = vector.broadcast %133 : vector<1x256xf32> to vector<8x256xf32>
    %136 = arith.addf %134, %135 : vector<8x256xf32>
    %137 = arith.subf %136, %126 : vector<8x256xf32>
    %cst_31 = arith.constant 9.99999971E-10 : f32
    %138 = vector.broadcast %cst_31 : f32 to vector<8x256xf32>
    %139 = arith.addf %137, %138 : vector<8x256xf32>
    %140 = arith.divf %126, %139 : vector<8x256xf32>
    %c0_32 = arith.constant 0 : index
    %c0_33 = arith.constant 0 : index
    %c0_34 = arith.constant 0 : index
    %141 = vector.load %arg8[%c0_32, %c0_33, %c0_34] : memref<1x8x256xf32, #tpu.memory_space<vmem>>, vector<1x8x256xf32>
    %142 = vector.shape_cast %141 : vector<1x8x256xf32> to vector<8x256xf32>
    %143 = vector.shape_cast %140 : vector<8x256xf32> to vector<1x8x256xf32>
    tpu.vector_store %arg8[%c0_32, %c0_33, %c0_34], %143 {strides = array<i32>} : memref<1x8x256xf32, #tpu.memory_space<vmem>>, vector<1x8x256xf32>,
    return
  }
  func.func @transform_0(%arg0: i32, %arg1: i32) -> (i32, i32, i32) {
    %c0_i32 = arith.constant 0 : i32
    %c0_i32_0 = arith.constant 0 : i32
    %c0_i32_1 = arith.constant 0 : i32
    return %arg0, %c0_i32, %c0_i32_0 : i32, i32, i32
  }
  func.func @transform_1(%arg0: i32, %arg1: i32) -> (i32, i32) {
    %c0_i32 = arith.constant 0 : i32
    %c0_i32_0 = arith.constant 0 : i32
    return %c0_i32, %arg1 : i32, i32
  }
  func.func @transform_2(%arg0: i32, %arg1: i32) -> (i32, i32, i32) {
    %c0_i32 = arith.constant 0 : i32
    %c0_i32_0 = arith.constant 0 : i32
    return %arg0, %c0_i32, %arg1 : i32, i32, i32
  }
  func.func @transform_3(%arg0: i32, %arg1: i32) -> (i32, i32, i32) {
    %c0_i32 = arith.constant 0 : i32
    %c0_i32_0 = arith.constant 0 : i32
    return %arg0, %c0_i32, %arg1 : i32, i32, i32
  }
  func.func @transform_4(%arg0: i32, %arg1: i32) -> (i32, i32, i32) {
    %c0_i32 = arith.constant 0 : i32
    %c0_i32_0 = arith.constant 0 : i32
    return %arg0, %c0_i32, %arg1 : i32, i32, i32
  }
  func.func @transform_5(%arg0: i32, %arg1: i32) -> (i32, i32, i32) {
    %c0_i32 = arith.constant 0 : i32
    %c0_i32_0 = arith.constant 0 : i32
    return %arg0, %c0_i32, %arg1 : i32, i32, i32
  }
  func.func @transform_6(%arg0: i32, %arg1: i32) -> (i32, i32, i32) {
    %c0_i32 = arith.constant 0 : i32
    %c0_i32_0 = arith.constant 0 : i32
    return %arg0, %c0_i32, %arg1 : i32, i32, i32
  }
  func.func @transform_7(%arg0: i32, %arg1: i32) -> (i32, i32, i32) {
    %c0_i32 = arith.constant 0 : i32
    %c0_i32_0 = arith.constant 0 : i32
    return %arg0, %c0_i32, %arg1 : i32, i32, i32
  }
}

</mosaic_0001>

<bundles_post_ra>
// kernel: tpu_custom_call.1
= control target key start
LH: loop header
LB: loop body
LE: loop exit
PB: predicated region body
PF: predicated region fallthrough
CT: control target
= control target key end

     0   :  { %s2158_s0 = inlined_call_operand.hbm [shape: f32[2,8,8], index: 0, kind: input, shape index: {}]   ;;  %s2159_s1 = inlined_call_operand.hbm [shape: f32[4,256], index: 1, kind: input, shape index: {}]   ;;  %s2160_s2 = inlined_call_operand.hbm [shape: f32[2,4,256], index: 2, kind: input, shape index: {}]   ;;  %s2161_s3 = inlined_call_operand.hbm [shape: f32[2,8,256], index: 3, kind: output, shape index: {0}]   ;;  %s2162_s4 = inlined_call_operand.hbm [shape: f32[2,8,256], index: 4, kind: output, shape index: {1}]   ;;  %s2163_s5 = inlined_call_operand.hbm [shape: s8[2,8,256], index: 5, kind: output, shape index: {2}]   ;;  %s2164_s6 = inlined_call_operand.hbm [shape: f32[2,8,256], index: 6, kind: output, shape index: {3}]   ;;  %s2165_s7 = inlined_call_operand.hbm [shape: s32[2,1,256], index: 7, kind: output, shape index: {4}]  }
   0x1   :  { %2170 = sst [smem:[#allocation22_spill]] %s2158_s0 }
   0x2   :  { %2171 = sst [smem:[#allocation23_spill]] %s2159_s1 }
   0x3   :  { %2172 = sst [smem:[#allocation24_spill]] %s2160_s2 }
   0x4   :  { %13 = vsyncpa [#allocation3], 0 }
   0x5   :  { %15 = vsyncpa [#allocation3 + $0x1], 0 }
   0x6   :  { %16 = vsyncpa [#allocation6], 0 }
   0x7   :  { %17 = vsyncpa [#allocation4], 0 }
   0x8   :  { %19 = vsyncpa [#allocation4 + $0x1], 0 }
   0x9   :  { %20 = vsyncpa [#allocation10], 0 }
   0xa   :  { %22 = vsyncpa [#allocation10 + $0x1], 0 }
   0xb   :  { %23 = vsyncpa [#allocation13], 0 }
   0xc   :  { %25 = vsyncpa [#allocation13 + $0x1], 0  ;;  %s1645_s24 = smov 0   ;;  %s1647_s25 = smov 0  }
   0xd   :  { %s1649_s26 = smov 0   ;;  %s1651_s27 = smov 0  }
   0xe   :  { %s1653_s28 = smov 0   ;;  %s1655_s29 = smov 0  }
   0xf LB: > { %s43_s30 = sadd.s32 1, %s1589_s28  ;;  %s50_s8 = sadd.s32 1, %s1581_s26  ;;  %s1593_s29 = sphi %s1655_s29, %s31_s29   ;;  %s1589_s28 = sphi %s1653_s28, %s2207_s28   ;;  %s1585_s27 = sphi %s1651_s27, %s2206_s27   ;;  %s1581_s26 = sphi %s1649_s26, %s2205_s26   ;;  %s1577_s25 = sphi %s1647_s25, %s2204_s25   ;;  %s1573_s24 = sphi %s1645_s24, %s2203_s24  }
  0x10   : > { %p45_p0 = scmp.ge.s32.totalorder %s43_s30, 2  ;;  %p57_p1 = scmp.ne.s32.totalorder %s1581_s26, %s1577_s25 }
  0x11   : > { %p58_p2 = scmp.eq.s32.totalorder %s1593_s29, 0  ;;  %p1115_p3 = scmp.ge.s32.totalorder %s1593_s29, 2 }
  0x12   : > { %s2209_s30 = smov (%p45_p0, %s43_s30), 0  ;;  %p1215_p5 = scmp.lt.s32.totalorder %s1593_s29, 2 }
  0x13   : > { %p1686_p4 = por %p58_p2, %p57_p1  ;;  %s47_s10 = ssub.s32 %s1589_s28, %s2209_s30 }
  0x14   : > { %s296_s11 = sand.u32 1, %s1593_s29   ;;  %p48_p6 = scmp.eq.s32.totalorder %s47_s10, 0 }
  0x15   : > { %s298_s12 = sand.u32 1, %s1581_s26   ;;  %s1117_s13 = sshll.u32 %s1589_s28, 3 }
  0x16   : > { %s1697_s14 = scalar_select %p48_p6, %s1581_s26, %s50_s8  }
  0x17   : > { %s1699_s15 = sshll.u32 %s298_s12, 3  ;;  %s2174_s0 = sld [smem:[#allocation22_spill]] }
  0x18   : > { %s300_s20 = scalar_lea.vmem [#allocation2], %s1699_s15  ;;  %p1709_p7 = pnand %p1215_p5, %p1686_p4 }
  0x19   : > { %s308_s21 = sshll.u32 %s300_s20, 4  ;;  %s2176_s2 = sld [smem:[#allocation24_spill]]  ;;  %s309_s21 = int_to_ptr.vmem [resolvable:$true] %s308_s21 }
  0x1a   : > { %s297_s12 = scalar_lea.sflag [#allocation3], %s296_s11  ;;  %s1719_s16 = sadd.s32 4294967295, %s1593_s29  }
  0x1b   : > { %s2166_s17 = sadd.s32 4294967294, %s1593_s29   ;;  %p63_p8 = scmp.ne.s32.totalorder %s1577_s25, %s1573_s24 }
  0x1c   : > { %p64_p9 = scmp.eq.s32.totalorder %s1719_s16, 0  ;;  %p143_p10 = scmp.eq.s32.totalorder %s1719_s16, 1 }
  0x1d   : > { %s304_s18 = scalar_lea.hbm %s2174_s0, %s1117_s13  ;;  %p149_p11 = scmp.eq.s32.totalorder %s2166_s17, 1 }
  0x1e   : > { %s306_s19 = sshll.u32 %s304_s18, 4  ;;  %p1113_p12 = scmp.ge.s32.totalorder %s1593_s29, 1  ;;  %s307_s19 = int_to_ptr.hbm [resolvable:$true] %s306_s19 }
  0x1f   : > { %s326_s10 = scalar_lea.hbm %s2176_s2, %s1117_s13  ;;  %p1731_p13 = por %p64_p9, %p63_p8 }
  0x20   : > { %1194 = dma.hbm_to_vmem [thread:$0]  (!%p1709_p7), %s307_s19, 128, %s309_s21, %s297_s12  }
  0x21   : > { %p1738_p0 = por %p143_p10, %p57_p1  ;;  %p1742_p2 = por %p149_p11, %p63_p8 }
  0x22   : > { %p268_p4 = scmp.lt.s32.totalorder %s1593_s29, 3  ;;  %s2181_s1 = sld [smem:[#allocation23_spill]] }
  0x23   : > { %s328_s23 = sshll.u32 %s326_s10, 4  ;;  %s1595_s8 = smov [#allocation5]   ;;  %s329_s23 = int_to_ptr.hbm [resolvable:$true] %s328_s23 }
  0x24   : > { %p1747_p5 = pnand %p1113_p12, %p268_p4  ;;  %s285_s17 = sshll.u32 %s1595_s8, 4  ;;  %s286_s17 = int_to_ptr.vmem [resolvable:$true] %s285_s17 }
  0x25   : > { %s319_s0 = scalar_lea.vmem [#allocation7], %s1699_s15 }
  0x26   : > { %p1187_p1 = pneg %p1747_p5  ;;  %s330_s2 = sshll.u32 %s319_s0, 4  ;;  %s331_s2 = int_to_ptr.vmem [resolvable:$true] %s330_s2 }
  0x27   : > { %1197 = dma.hbm_to_vmem [thread:$0]  (!%p1709_p7), %s329_s23, 128, %s331_s2, %s297_s12  }
  0x28   : > { %s283_s21 = sshll.u32 %s2181_s1, 4  ;;  %p1188_p6 = pnand %p1187_p1, %p64_p9  ;;  %s284_s21 = int_to_ptr.hbm [resolvable:$true] %s283_s21 }
  0x29   : > { %339 = sbr.rel (%p1747_p5) target bundleno = 284 (0x11c), region = 32 }
  0x2a   : > { %1190 = dma.hbm_to_vmem [thread:$0]  (!%p1188_p6), %s284_s21, 128, %s286_s17, [#allocation6]  }
  0x2e   : > { %s1764_s10 = sand.u32 1, %s1719_s16   ;;  %s1767_s19 = sand.u32 1, %s1577_s25  }
  0x2f   : > { %s1122_s20 = sshll.u32 %s1767_s19, 3  ;;  %s342_s15 = scalar_lea.sflag [#allocation3], %s1764_s10 }
  0x30   : > { %s345_s0 = scalar_lea.vmem [#allocation2], %s1122_s20 }
  0x31   : > { %1548 = dma.done.wait (%p1731_p13), %s342_s15, 128  }
  0x32   : > { %1550 = vsyncadd (%p1731_p13), %s342_s15, 4294967168 }
  0x33   : > { %1552 = dma.done.wait (%p64_p9), [#allocation6], 128  }
  0x34   : > { %1554 = vsyncadd (%p64_p9), [#allocation6], 4294967168  ;;  %s360_s2 = scalar_lea.vmem [#allocation7], %s1122_s20 }
  0x35   : > { %1556 = dma.done.wait (%p1731_p13), %s342_s15, 128  }
  0x36   : > { %1558 = vsyncadd (%p1731_p13), %s342_s15, 4294967168  ;;  %v1596_v0 = vmov 2   ;;  %v1597_v1 = vmov 0   ;;  %v1598_v2 = vmov 6   ;;  %v424_v3 = vld [vmem:[%s345_s0] sm:$0xff]  ;;  %v1599_v4 = vmov 3  }
  0x37   : > { %1278 = vset.pattern.permute.xlu1 %v1596_v0  ;;  %1276 = vset.pattern.permute.xlu0 %v1597_v1  ;;  %v1600_v5 = vmov 1   ;;  %v1601_v6 = vmov 7   ;;  %v1602_v7 = vmov 4   ;;  %v1603_v8 = vmov 5   ;;  %v425_v9 = vld [vmem:[#allocation5] sm:$0xff]  ;;  %v1783_v10 = vld [vmem:[%s360_s2] sm:$0xff] }
  0x38   : > { %1280 = vset.pattern.permute.xlu2 %v1598_v2  ;;  %461 = vperm.xlu1 %1278, %v424_v3   ;;  %v694_v11 = vrot.slane %v1783_v10, 6  ;;  %v427_v12 = vrot.slane %v425_v9, 6  ;;  %v464_v18 = vperm.slane %v425_v9, 2  ;;  %v465_v19 = vperm.slane %v425_v9, 6  ;;  %s1834_s22 = sshll.u32 %s1585_s27, 4  ;;  %s1841_s12 = sshll.u32 %s1767_s19, 4 }
  0x39   : > { %437 = vperm.xlu0 %1276, %v424_v3   ;;  %495 = vperm.xlu2 %1280, %v424_v3   ;;  %v440_v22 = vperm.slane %v425_v9, 0  ;;  %v441_v23 = vperm.slane %v425_v9, 4  ;;  %v652_v25 = vperm.slane %v1783_v10, 0  ;;  %v653_v26 = vperm.slane %v1783_v10, 4  ;;  %s803_s9 = scalar_lea.hbm %s2162_s4, %s1834_s22  ;;  %s1856_s18 = scalar_lea.vmem [#allocation9], %s1841_s12 }
  0x3a   : > { %v696_v13 = vsub.f32 %v1783_v10, %v694_v11  ;;  %v584_v14 = vrot.slane %v427_v12, 4  ;;  %v429_v15 = vsub.f32 %v425_v9, %v427_v12  ;;  %v668_v27 = vperm.slane %v1783_v10, 2  ;;  %s805_s21 = sshll.u32 %s1856_s18, 4  ;;  %s1860_s23 = sshll.u32 %s803_s9, 4  ;;  %s1871_s21 = int_to_ptr.vmem [resolvable:$true] %s805_s21  ;;  %s808_s23 = int_to_ptr.hbm [resolvable:$true] %s1860_s23 }
  0x3b   : > { %v669_v28 = vperm.slane %v1783_v10, 6  ;;  %v468_v29 = vperm.slane %v464_v18, 2  ;;  %v469_v30 = vperm.slane %v465_v19, 2  ;;  %v444_v34 = vperm.slane %v440_v22, 0  ;;  %s1153_s20 = sshll.u32 %s1585_s27, 2  ;;  %s2169_s15 = scalar_lea.sflag [#allocation10], %s1764_s10 }
  0x3c   : > { %v697_v16 = vmax.f32 %v696_v13, 0.0  ;;  %v586_v17 = vadd.f32 %v584_v14, %v425_v9  ;;  %v1130_v20 = vrot.slane %v429_v15, 9  ;;  %v445_v35 = vperm.slane %v441_v23, 0  ;;  %s1397_s0 = sshra.s32 %s808_s23, 4  ;;  %s1403_s9 = scalar_lea.hbm %s2162_s4, 32  ;;  %s1398_s0 = int_to_ptr.hbm [resolvable:$true] %s1397_s0 }
  0x3d   : > { %v476_v38 = vperm.slane %v425_v9, 3  ;;  %v477_v39 = vperm.slane %v425_v9, 7  ;;  %v452_v40 = vperm.slane %v425_v9, 1  ;;  %v656_v41 = vperm.slane %v652_v25, 0  ;;  %s1399_s2 = scalar_lea.hbm %s1398_s0, 16  ;;  %p1404_p10 = scmp.lt.s32.totalorder %s1398_s0, %s2162_s4 }
  0x3e   : > { %v1133_v21 = vrot.slane %v697_v16, 9  ;;  %v587_v24 = vmul.f32 0.5, %v586_v17  ;;  %v434_v31 = vmul.f32 %v1130_v20, %v429_v15  ;;  %v453_v42 = vperm.slane %v425_v9, 5  ;;  %p1400_p7 = scmp.ne.s32.totalorder %s1398_s0, %s1399_s2  ;;  %p1405_p11 = scmp.lt.s32.totalorder %s1403_s9, %s1399_s2 }
  0x3f   : > { %v657_v43 = vperm.slane %v653_v26, 0  ;;  %v672_v44 = vperm.slane %v668_v27, 2  ;;  %v673_v45 = vperm.slane %v669_v28, 2  ;;  %v660_v52 = vperm.slane %v1783_v10, 1 }
  0x40   : > { %1279 = vset.pattern.permute.xlu1 %v1599_v4  ;;  %v702_v33 = vmul.f32 %v1133_v21, %v697_v16  ;;  %v593_v36 = vperm.slane %v587_v24, 0  ;;  %v594_v37 = vperm.slane %v587_v24, 4  ;;  %v499_v46 = vperm.slane %v434_v31, 2  ;;  %p1401_p8 = pnand %p1400_p7, %p1738_p0  ;;  %p1406_p12 = por %p1405_p11, %p1404_p10 }
  0x41   : > { %1277 = vset.pattern.permute.xlu0 %v1600_v5  ;;  %473 = vperm.xlu1 %1279, %v424_v3   ;;  %v500_v47 = vperm.slane %v434_v31, 6  ;;  %v661_v53 = vperm.slane %v1783_v10, 5  ;;  %v480_v56 = vperm.slane %v476_v38, 3  ;;  %v481_v57 = vperm.slane %v477_v39, 3 }
  0x42   : > { %449 = vperm.xlu0 %1277, %v424_v3   ;;  %1281 = vset.pattern.permute.xlu2 %v1601_v6  ;;  %v708_v48 = vperm.slane %v702_v33, 2  ;;  %v709_v49 = vperm.slane %v702_v33, 6  ;;  %v1797_v54 = vperm.slane %v593_v36, 0  ;;  %v1799_v55 = vperm.slane %v594_v37, 0  ;;  %p1402_p9 = pneg %p1401_p8 }
  0x43   : > { %704 = vperm.xlu2 %1281, %v424_v3   ;;  %v456_v58 = vperm.slane %v452_v40, 1  ;;  %v676_v59 = vperm.slane %v1783_v10, 3  ;;  %v457_v60 = vperm.slane %v453_v42, 1  ;;  %v677_v61 = vperm.slane %v1783_v10, 7 }
  0x44   : > { %v605_v62 = vperm.slane %v587_v24, 1  ;;  %v606_v63 = vperm.slane %v587_v24, 5  ;;  %v503_v0 = vperm.slane %v499_v46, 2  ;;  %v504_v1 = vperm.slane %v500_v47, 2  ;;  %p1407_p13 = pnand %p1406_p12, %p1402_p9 }
  0x45   : > { %v712_v2 = vperm.slane %v708_v48, 2  ;;  %v664_v13 = vperm.slane %v660_v52, 1  ;;  %v665_v14 = vperm.slane %v661_v53, 1  ;;  %v680_v15 = vperm.slane %v676_v59, 3 }
  0x46   : > { %v681_v16 = vperm.slane %v677_v61, 3  ;;  %v609_v19 = vperm.slane %v605_v62, 1  ;;  %v610_v20 = vperm.slane %v606_v63, 1 }
  0x49   : > { %1282 = vset.pattern.permute.xlu1 %v1602_v7 }
  0x4a   : > { %1284 = vset.pattern.permute.xlu0 %v1601_v6  ;;  %589 = vperm.xlu1 %1282, %v424_v3  }
  0x4b   : > { %1283 = vset.pattern.permute.xlu2 %v1603_v8 }
  0x4c   : > { %602 = vperm.xlu2 %1283, %v424_v3   ;;  %v713_v3 = vperm.slane %v709_v49, 2 }
  0x93   : > { %v496_v32 = vpop.permute.xlu2 %495 }
  0x94   : > { %v505_v17 = vadd.f32 %v503_v0, %v496_v32  ;;  %v506_v18 = vadd.f32 %v504_v1, %v496_v32 }
  0x9d   : > { %v705_v8 = vpop.permute.xlu2 %704 }
  0x9e   : > { %v714_v23 = vadd.f32 %v712_v2, %v705_v8  ;;  %v715_v24 = vadd.f32 %v713_v3, %v705_v8 }
  0xaa   : > { %v1791_v50 = vpop.permute.xlu1 %461 }
  0xab   : > { %v1793_v51 = vpop.permute.xlu0 %437  ;;  %v470_v4 = vmin.f32 %v1791_v50, %v468_v29  ;;  %v471_v5 = vmin.f32 %v1791_v50, %v469_v30  ;;  %v674_v10 = vmin.f32 %v1791_v50, %v672_v44  ;;  %v675_v12 = vmin.f32 %v1791_v50, %v673_v45 }
  0xac   : > { %v446_v6 = vmax.f32 %v1793_v51, %v444_v34  ;;  %v447_v7 = vmax.f32 %v1793_v51, %v445_v35  ;;  %v658_v9 = vmax.f32 %v1793_v51, %v656_v41  ;;  %v659_v11 = vmax.f32 %v1793_v51, %v657_v43 }
  0xad   : > { %v627_v29 = vsub.f32 %v1791_v50, %v1797_v54  ;;  %v628_v30 = vsub.f32 %v1791_v50, %v1799_v55  ;;  %v621_v41 = vsub.f32 %v1797_v54, %v1793_v51  ;;  %v622_v42 = vsub.f32 %v1799_v55, %v1793_v51 }
  0xae   : > { %v484_v21 = vsub.f32 %v470_v4, %v446_v6  ;;  %v485_v22 = vsub.f32 %v471_v5, %v447_v7  ;;  %v684_v27 = vsub.f32 %v674_v10, %v658_v9  ;;  %v685_v28 = vsub.f32 %v675_v12, %v659_v11 }
  0xb0   : > { %v486_v47 = vmax.f32 %v484_v21, 0.0  ;;  %v487_v48 = vmax.f32 %v485_v22, 0.0  ;;  %v686_v52 = vmax.f32 %v684_v27, 0.0  ;;  %v687_v53 = vmax.f32 %v685_v28, 0.0 }
  0xb3   : > { %v474_v25 = vpop.permute.xlu1 %473 }
  0xb4   : > { %v450_v26 = vpop.permute.xlu0 %449  ;;  %v482_v31 = vmin.f32 %v474_v25, %v480_v56  ;;  %v483_v33 = vmin.f32 %v474_v25, %v481_v57  ;;  %v682_v37 = vmin.f32 %v474_v25, %v680_v15  ;;  %v683_v38 = vmin.f32 %v474_v25, %v681_v16 }
  0xb5   : > { %v458_v34 = vmax.f32 %v450_v26, %v456_v58  ;;  %v459_v32 = vmax.f32 %v450_v26, %v457_v60  ;;  %v666_v35 = vmax.f32 %v450_v26, %v664_v13  ;;  %v667_v36 = vmax.f32 %v450_v26, %v665_v14  ;;  %v603_v58 = vpop.permute.xlu2 %602 }
  0xb6   : > { %v623_v45 = vsub.f32 %v609_v19, %v450_v26  ;;  %v629_v46 = vsub.f32 %v474_v25, %v609_v19  ;;  %v624_v61 = vsub.f32 %v610_v20, %v450_v26  ;;  %v630_v51 = vsub.f32 %v474_v25, %v610_v20 }
  0xb7   : > { %v488_v39 = vsub.f32 %v482_v31, %v458_v34  ;;  %v489_v40 = vsub.f32 %v483_v33, %v459_v32  ;;  %v688_v43 = vsub.f32 %v682_v37, %v666_v35  ;;  %v689_v44 = vsub.f32 %v683_v38, %v667_v36 }
  0xb8   : > { %v631_v0 = vmin.f32 %v627_v29, %v629_v46  ;;  %v625_v1 = vmin.f32 %v621_v41, %v623_v45  ;;  %v611_v4 = vsub.f32 %v603_v58, %v609_v19  ;;  %v612_v5 = vsub.f32 %v603_v58, %v610_v20 }
  0xb9   : > { %v490_v49 = vmax.f32 %v488_v39, 0.0  ;;  %v491_v50 = vmax.f32 %v489_v40, 0.0  ;;  %v690_v56 = vmax.f32 %v688_v43, 0.0  ;;  %v691_v57 = vmax.f32 %v689_v44, 0.0 }
  0xba   : > { %v632_v13 = vmin.f32 %v628_v30, %v630_v51  ;;  %v626_v14 = vmin.f32 %v622_v42, %v624_v61  ;;  %v633_v16 = vmin.f32 %v625_v1, %v631_v0  ;;  %v1604_v29 = vmov 0.0  }
  0xbb   : > { %v1819_v59 = vmul.f32 %v490_v49, %v486_v47  ;;  %v1821_v60 = vmul.f32 %v491_v50, %v487_v48  ;;  %v1823_v62 = vmul.f32 %v690_v56, %v686_v52  ;;  %v1825_v63 = vmul.f32 %v691_v57, %v687_v53 }
  0xbc   : > { %v590_v6 = vpop.permute.xlu1 %589  ;;  %v634_v21 = vmin.f32 %v626_v14, %v632_v13  ;;  %vm635_vm0 = vcmp.gt.f32.partialorder %v633_v16, 1e-09 }
  0xbd   : > { %v507_v2 = vsub.f32 %v505_v17, %v1819_v59  ;;  %v508_v3 = vsub.f32 %v506_v18, %v1821_v60  ;;  %v716_v7 = vsub.f32 %v714_v23, %v1823_v62  ;;  %v717_v8 = vsub.f32 %v715_v24, %v1825_v63 }
  0xbe   : > { %v599_v9 = vsub.f32 %v590_v6, %v1797_v54  ;;  %v600_v11 = vsub.f32 %v590_v6, %v1799_v55  ;;  %v615_v55 = vmul.f32 %v611_v4, %v611_v4  ;;  %v616_v17 = vmul.f32 %v612_v5, %v612_v5 }
  0xbf   : > { %v1836_v10 = vmax.f32 %v507_v2, 1e-06  ;;  %v1838_v12 = vmax.f32 %v508_v3, 1e-06  ;;  %v1843_v15 = vadd.f32 1e-09, %v716_v7 }
  0xc0   : > { %v1846_v54 = vadd.f32 1e-09, %v717_v8  ;;  %v613_v18 = vmul.f32 %v599_v9, %v599_v9  ;;  %v614_v19 = vmul.f32 %v600_v11, %v600_v11  ;;  %vm636_vm3 = vcmp.gt.f32.partialorder %v634_v21, 1e-09 }
  0xc1   : > { %1285 = vrcp.f32 %v1836_v10  ;;  %v522_v20 = vand.u32 2147483648, %v1836_v10  ;;  %v520_v22 = vand.u32 2147483647, %v1836_v10  ;;  %v535_v23 = vand.u32 2147483647, %v1838_v12 }
  0xc2   : > { %1287 = vrcp.f32 %v1838_v12  ;;  %v537_v24 = vand.u32 2147483648, %v1838_v12  ;;  %vm516_vm1 = vweird.f32 %v1836_v10  ;;  %v617_v25 = vadd.f32 %v615_v55, %v613_v18 }
  0xc3   : > { %1289 = vrcp.f32 %v1843_v15  ;;  %v618_v26 = vadd.f32 %v616_v17, %v614_v19  ;;  %v1868_v28 = vor.u32 1.1754944e-38, %v522_v20  ;;  %vm531_vm2 = vweird.f32 %v1838_v12 }
  0xc4   : > { %1291 = vrcp.f32 %v1846_v54  ;;  %v1131_v30 = vsel %vm635_vm0, 1.0, %v1604_v29  ;;  %vm1878_vm4 = vcmp.eq.f32.partialorder %v520_v22, 8.507059e+37  ;;  %vm725_vm5 = vweird.f32 %v1843_v15  ;;  %619 = vst [vmem:[%s1856_s18] sm:$0xff] %v617_v25 }
  0xc5   : > { %v1132_v32 = vsel %vm636_vm3, 1.0, %v1604_v29  ;;  %v641_v35 = vmax.f32 %v1131_v30, -128.0  ;;  %vm1890_vm6 = vcmp.eq.f32.partialorder %v535_v23, 8.507059e+37  ;;  %v1894_v39 = vor.u32 1.1754944e-38, %v537_v24  ;;  %620 = vst [vmem:[%s1856_s18 + $0x8] sm:$0xff] %v618_v26 }
  0xc6   : > { %v729_v40 = vand.u32 2147483647, %v1843_v15  ;;  %v642_v41 = vmax.f32 %v1132_v32, -128.0  ;;  %v731_v44 = vand.u32 2147483648, %v1843_v15 }
  0xc7   : > { %v1866_v27 = vpop.eup %1285  ;;  %v643_v45 = vmin.f32 %v641_v35, 127.0 }
  0xc8   : > { %v1874_v31 = vpop.eup %1287  ;;  %v512_v33 = vmul.f32 %v1866_v27, %v1836_v10 }
  0xc9   : > { %v1886_v36 = vpop.eup %1289  ;;  %v527_v37 = vmul.f32 %v1874_v31, %v1838_v12 }
  0xca   : > { %v513_v42 = vsub.f32 1.0, %v512_v33  ;;  %v721_v43 = vmul.f32 %v1886_v36, %v1843_v15 }
  0xcb   : > { %1410 = shalt.err (!%p1407_p13)
}
  0xcc   : > { %1178 = dma.vmem_to_hbm [thread:$0]  (%p1738_p0), %s1871_s21, 256, %s808_s23, %s2169_s15   ;;  %v1919_v46 = vpop.eup %1291  ;;  %v528_v47 = vsub.f32 1.0, %v527_v37  ;;  %vm740_vm7 = vweird.f32 %v1846_v54  ;;  %v744_v48 = vand.u32 2147483647, %v1846_v54  ;;  %v644_v49 = vmin.f32 %v642_v41, 127.0 }
  0xcd   : > { %s1928_s2 = scalar_lea.hbm %s2163_s5, %s1153_s20  ;;  %v514_v50 = vmul.f32 %v1866_v27, %v513_v42  ;;  %vm517_vm8 = vweird.f32 %v1866_v27  ;;  %v722_v52 = vsub.f32 1.0, %v721_v43  ;;  %v736_v53 = vmul.f32 %v1919_v46, %v1846_v54  ;;  %s837_s16 = scalar_lea.hbm %s2164_s6, %s1834_s22 }
  0xce   : > { %v529_v56 = vmul.f32 %v1874_v31, %v528_v47  ;;  %vm532_vm9 = vweird.f32 %v1874_v31  ;;  %s786_s9 = scalar_lea.hbm %s2161_s3, %s1834_s22  ;;  %v1166_v57 = vcvt.f32.s32 %v643_v45  ;;  %v1168_v58 = vcvt.f32.s32 %v644_v49  ;;  %s2186_s18 = sshll.u32 %s1767_s19, 2  ;;  %vm1957_vm11 = vmor %vm516_vm1, %vm517_vm8 }
  0xcf   : > { %v515_v61 = vadd.f32 %v1866_v27, %v514_v50  ;;  %v723_v51 = vmul.f32 %v1886_v36, %v722_v52  ;;  %vm726_vm10 = vweird.f32 %v1886_v36  ;;  %v737_v0 = vsub.f32 1.0, %v736_v53  ;;  %s1949_s8 = scalar_lea.vmem [#allocation11], %s2186_s18  ;;  %s824_s21 = sshll.u32 %s1928_s2, 4  ;;  %vm1978_vm13 = vmor %vm531_vm2, %vm532_vm9  ;;  %s2003_s21 = int_to_ptr.hbm [resolvable:$true] %s824_s21 }
  0xd0   : > { %s822_s0 = sshll.u32 %s1949_s8, 4  ;;  %v530_v2 = vadd.f32 %v1874_v31, %v529_v56  ;;  %vm1962_vm12 = vcmp.eq.f32.partialorder %v729_v40, 8.507059e+37  ;;  %v746_v4 = vand.u32 2147483648, %v1846_v54  ;;  %s1968_s23 = scalar_lea.vmem [#allocation12], %s1841_s12  ;;  %v647_v5 = vpack.c.b16 %v1168_v58, %v1166_v57  ;;  %vm727_vm15 = vmor %vm725_vm5, %vm726_vm10  ;;  %s2001_s0 = int_to_ptr.vmem [resolvable:$true] %s822_s0 }
  0xd1   : > { %v519_v6 = vsel %vm1957_vm11, %v1866_v27, %v515_v61  ;;  %v724_v8 = vadd.f32 %v1886_v36, %v723_v51  ;;  %v738_v9 = vmul.f32 %v1919_v46, %v737_v0  ;;  %vm741_vm14 = vweird.f32 %v1919_v46  ;;  %s1986_s20 = scalar_lea.vmem [#allocation8], %s1841_s12  ;;  %s1989_s18 = sshll.u32 %s786_s9, 4 }
  0xd2   : > { %s788_s17 = sshll.u32 %s1986_s20, 4  ;;  %2193 = sst [smem:[#allocation21_spill]] %s1989_s18  ;;  %v524_v11 = vsel %vm1878_vm4, %v1868_v28, %v519_v6  ;;  %v534_v10 = vsel %vm1978_vm13, %v1874_v31, %v530_v2  ;;  %v732_v12 = vor.u32 1.1754944e-38, %v731_v44  ;;  %v648_v13 = vpack.c.b8 %v647_v5, %v647_v5  ;;  %vm2029_vm0 = vmor %vm740_vm7, %vm741_vm14  ;;  %s2033_s17 = int_to_ptr.vmem [resolvable:$true] %s788_s17 }
  0xd3   : > { %v2006_v14 = vmul.f32 %v524_v11, %v1819_v59  ;;  %v539_v16 = vsel %vm1890_vm6, %v1894_v39, %v534_v10  ;;  %v728_v15 = vsel %vm727_vm15, %v1886_v36, %v724_v8  ;;  %v739_v55 = vadd.f32 %v1919_v46, %v738_v9  ;;  %s2018_s2 = sshll.u32 %s837_s16, 4  ;;  %s1425_s22 = sshra.s32 %s2003_s21, 4  ;;  %s1426_s22 = int_to_ptr.hbm [resolvable:$true] %s1425_s22  ;;  %s842_s2 = int_to_ptr.hbm [resolvable:$true] %s2018_s2 }
  0xd4   : > { %v2021_v17 = vmul.f32 %v539_v16, %v1821_v60  ;;  %v733_v59 = vsel %vm1962_vm12, %v732_v12, %v728_v15  ;;  %v747_v19 = vor.u32 1.1754944e-38, %v746_v4  ;;  %649 = vst [vmem:[%s1949_s8] sm:$0xf] %v648_v13  ;;  %vm2042_vm1 = vcmp.eq.f32.partialorder %v744_v48, 8.507059e+37  ;;  %s1427_s16 = scalar_lea.hbm %s1426_s22, 4  ;;  %s1431_s9 = scalar_lea.hbm %s2163_s5, 8 }
  0xd5   : > { %v546_v60 = vrot.slane %v2006_v14, 4  ;;  %v734_v20 = vmul.f32 %v733_v59, %v1823_v62  ;;  %v743_v21 = vsel %vm2029_vm0, %v1919_v46, %v739_v55  ;;  %541 = vst [vmem:[%s1986_s20] sm:$0xff] %v2006_v14  ;;  %p1428_p4 = scmp.ne.s32.totalorder %s1426_s22, %s1427_s16  ;;  %p1432_p6 = scmp.lt.s32.totalorder %s1426_s22, %s2163_s5 }
  0xd6   : > { %p1433_p7 = scmp.lt.s32.totalorder %s1431_s9, %s1427_s16 }
  0xd7   : > { %p1429_p5 = pnand %p1428_p4, %p1738_p0 }
  0xd8   : > { %p1434_p8 = por %p1433_p7, %p1432_p6 }
  0xd9   : > { %p1430_p1 = pneg %p1429_p5 }
  0xdb   : > { %p1435_p9 = pnand %p1434_p8, %p1430_p1 }
  0xdd   : > { %1438 = shalt.err (!%p1435_p9)
}
  0xde   : > { %s2198_s1 = scalar_lea.sflag [#allocation10], %s1764_s10  ;;  %s2199_s8 = sld [smem:[#allocation21_spill]]  ;;  %v552_v62 = vrot.slane %v2021_v17, 4  ;;  %v748_v54 = vsel %vm2042_vm1, %v747_v19, %v743_v21  ;;  %542 = vst [vmem:[%s1986_s20 + $0x8] sm:$0xff] %v2021_v17  ;;  %v543_v23 = vlaneseq  ;;  %v547_v24 = vmax.f32 %v2006_v14, %v546_v60 }
  0xdf   : > { %1179 = dma.vmem_to_hbm [thread:$0]  (%p1738_p0), %s2001_s0, 64, %s2003_s21, %s2198_s1   ;;  %v749_v25 = vmul.f32 %v748_v54, %v1825_v63  ;;  %750 = vst [vmem:[%s1968_s23] sm:$0xff] %v734_v20 }
  0xe0   : > { %s2200_s15 = sshll.u32 %s1968_s23, 4  ;;  %s753_s18 = scalar_lea.sflag [#allocation4], %s1767_s19  ;;  %s2068_s15 = int_to_ptr.vmem [resolvable:$true] %s2200_s15 }
  0xe1   : > { %s1459_s12 = scalar_lea.hbm %s2161_s3, 32 }
  0xe4   : > { %s2201_s22 = int_to_ptr.hbm [resolvable:$true] %s2199_s8 }
  0xe5   : > { %s1453_s1 = sshra.s32 %s2201_s22, 4  ;;  %s1454_s1 = int_to_ptr.hbm [resolvable:$true] %s1453_s1 }
  0xe6   : > { %s1455_s0 = scalar_lea.hbm %s1454_s1, 16  ;;  %p1460_p13 = scmp.lt.s32.totalorder %s1454_s1, %s2161_s3 }
  0xe7   : > { %p1456_p10 = scmp.ne.s32.totalorder %s1454_s1, %s1455_s0  ;;  %p1461_p4 = scmp.lt.s32.totalorder %s1459_s12, %s1455_s0 }
  0xe9   : > { %p1457_p11 = pnand %p1456_p10, %p1738_p0  ;;  %p1462_p5 = por %p1461_p4, %p1460_p13 }
  0xeb   : > { %p1458_p12 = pneg %p1457_p11 }
  0xed   : > { %p1463_p1 = pnand %p1462_p5, %p1458_p12 }
  0xef   : > { %1466 = shalt.err (!%p1463_p1)
}
  0xf0   : > { %1177 = dma.vmem_to_hbm [thread:$0]  (%p1738_p0), %s2033_s17, 256, %s2201_s22, %s753_s18   ;;  %v553_v63 = vmax.f32 %v2021_v17, %v552_v62  ;;  %v548_v26 = vrot.slane %v547_v24, 2  ;;  %751 = vst [vmem:[%s1968_s23 + $0x8] sm:$0xff] %v749_v25 }
  0xf1   : > { %s768_s1 = scalar_lea.sflag [#allocation13], %s1764_s10  ;;  %s1481_s0 = sshra.s32 %s842_s2, 4  ;;  %s1482_s0 = int_to_ptr.hbm [resolvable:$true] %s1481_s0 }
  0xf2   : > { %v554_v27 = vrot.slane %v553_v63, 2  ;;  %s1483_s21 = scalar_lea.hbm %s1482_s0, 16  ;;  %s1487_s12 = scalar_lea.hbm %s2164_s6, 32 }
  0xf3   : > { %p1484_p6 = scmp.ne.s32.totalorder %s1482_s0, %s1483_s21  ;;  %p1488_p9 = scmp.lt.s32.totalorder %s1482_s0, %s2164_s6 }
  0xf4   : > { %p1489_p10 = scmp.lt.s32.totalorder %s1487_s12, %s1483_s21 }
  0xf5   : > { %p1485_p7 = pnand %p1484_p6, %p1738_p0 }
  0xf6   : > { %p1490_p11 = por %p1489_p10, %p1488_p9 }
  0xf7   : > { %p1486_p8 = pneg %p1485_p7 }
  0xf9   : > { %p1491_p12 = pnand %p1490_p11, %p1486_p8 }
  0xfb   : > { %1494 = shalt.err (!%p1491_p12)
}
  0xfc   : > { %1180 = dma.vmem_to_hbm [thread:$0]  (%p1738_p0), %s2068_s15, 256, %s842_s2, %s768_s1   ;;  %v544_v28 = vshrl.u32 %v543_v23, 7  ;;  %v549_v29 = vmax.f32 %v547_v24, %v548_v26  ;;  %v555_v30 = vmax.f32 %v553_v63, %v554_v27  ;;  %vm577_vm6 = vcmask 1040384  }
  0xfd   : > { %s1129_s23 = sshll.u32 %s1767_s19, 1  ;;  %s1147_s2 = sshll.u32 %s1585_s27, 1  ;;  %vm581_vm7 = vcmp.lt.s32.totalorder %v543_v23, 256 }
  0xfe   : > { %v550_v31 = vrot.slane %v549_v29, 1  ;;  %v545_v33 = vcvt.s32.f32 %v544_v28  ;;  %v556_v34 = vrot.slane %v555_v30, 1  ;;  %s853_s9 = scalar_lea.hbm %s2165_s7, %s1147_s2  ;;  %s416_s22 = scalar_lea.vmem [#allocation14], %s1129_s23 }
  0xff   : > { %s855_s0 = sshll.u32 %s416_s22, 4  ;;  %s857_s19 = sshll.u32 %s853_s9, 4  ;;  %s856_s0 = int_to_ptr.vmem [resolvable:$true] %s855_s0  ;;  %s858_s19 = int_to_ptr.hbm [resolvable:$true] %s857_s19 }
 0x100   : > { %v551_v32 = vmax.f32 %v549_v29, %v550_v31  ;;  %v557_v35 = vmax.f32 %v555_v30, %v556_v34  ;;  %s1509_s27 = sshra.s32 %s858_s19, 4  ;;  %s1515_s12 = scalar_lea.hbm %s2165_s7, 4  ;;  %s1510_s27 = int_to_ptr.hbm [resolvable:$true] %s1509_s27 }
 0x101   : > { %s1511_s21 = scalar_lea.hbm %s1510_s27, 2  ;;  %p1516_p1 = scmp.lt.s32.totalorder %s1510_s27, %s2165_s7 }
 0x102   : > { %vm558_vm2 = vcmp.eq.f32.partialorder %v2006_v14, %v551_v32  ;;  %vm559_vm3 = vcmp.eq.f32.partialorder %v2021_v17, %v557_v35  ;;  %p1512_p13 = scmp.ne.s32.totalorder %s1510_s27, %s1511_s21  ;;  %p1517_p6 = scmp.lt.s32.totalorder %s1515_s12, %s1511_s21 }
 0x103   : > { %v560_v36 = vsel %vm558_vm2, %v545_v33, 1e+09  ;;  %v561_v37 = vsel %vm559_vm3, %v545_v33, 1e+09 }
 0x104   : > { %v562_v38 = vrot.slane %v560_v36, 4  ;;  %v568_v39 = vrot.slane %v561_v37, 4  ;;  %p1513_p4 = pnand %p1512_p13, %p1738_p0  ;;  %p1518_p7 = por %p1517_p6, %p1516_p1 }
 0x106   : > { %v563_v40 = vmin.f32 %v560_v36, %v562_v38  ;;  %v569_v41 = vmin.f32 %v561_v37, %v568_v39  ;;  %p1514_p5 = pneg %p1513_p4 }
 0x108   : > { %v564_v42 = vrot.slane %v563_v40, 2  ;;  %v570_v43 = vrot.slane %v569_v41, 2  ;;  %p1519_p8 = pnand %p1518_p7, %p1514_p5 }
 0x10a   : > { %v565_v44 = vmin.f32 %v563_v40, %v564_v42  ;;  %v571_v45 = vmin.f32 %v569_v41, %v570_v43 }
 0x10c   : > { %v566_v46 = vrot.slane %v565_v44, 1  ;;  %v572_v47 = vrot.slane %v571_v45, 1 }
 0x10e   : > { %v567_v48 = vmin.f32 %v565_v44, %v566_v46  ;;  %v573_v49 = vmin.f32 %v571_v45, %v572_v47 }
 0x110   : > { %vm1155_vm4 = vcmp.lt.s32.totalorder %v567_v48, 0  ;;  %v1156_v50 = vceil.f32 %v567_v48  ;;  %v1157_v52 = vfloor.f32 %v567_v48  ;;  %vm1160_vm5 = vcmp.lt.s32.totalorder %v573_v49, 0 }
 0x111   : > { %v1161_v53 = vceil.f32 %v573_v49  ;;  %v1162_v56 = vfloor.f32 %v573_v49 }
 0x112   : > { %v1158_v57 = vsel %vm1155_vm4, %v1156_v50, %v1157_v52 }
 0x113   : > { %v1163_v58 = vsel %vm1160_vm5, %v1161_v53, %v1162_v56  ;;  %v1159_v51 = vcvt.f32.s32 %v1158_v57 }
 0x114   : > { %v1164_v61 = vcvt.f32.s32 %v1163_v58 }
 0x116   : > { %v576_v0 = vrot.slane %v1164_v61, 7 }
 0x118   : > { %v578_v1 = vsel %vm577_vm6, %v1159_v51, %v576_v0 }
 0x119   : > { %583 = vst.msk [vmem:[%s416_s22] sm:$0x3] %vm581_vm7, %v578_v1 }
 0x11a   : > { %1522 = shalt.err (!%p1519_p8)
}
 0x11b   : > { %1181 = dma.vmem_to_hbm [thread:$0]  (%p1738_p0), %s856_s0, 32, %s858_s19, %s768_s1  }
 0x11c PF: > { %s869_s23 = sand.u32 1, %s1573_s24   ;;  %p1199_p9 = pnand %p1115_p3, %p1742_p2 }
 0x11d   : > { %s870_s2 = scalar_lea.sflag [#allocation4], %s869_s23 }
 0x11e   : > { %p1200_p10 = pneg %p1199_p9 }
 0x120   : > { %1560 = dma.done.wait (%p1200_p10), %s870_s2, 256  }
 0x121   : > { %1562 = vsyncadd (%p1200_p10), %s870_s2, 4294967040  ;;  %s2202_s15 = sadd.s32 4294967294, %s1593_s29  }
 0x122   : > { %s879_s18 = sand.u32 1, %s2202_s15  }
 0x123   : > { %s880_s9 = scalar_lea.sflag [#allocation10], %s879_s18 }
 0x124   : > { %1564 = dma.done.wait (%p1200_p10), %s880_s9, 320  }
 0x125   : > { %1566 = vsyncadd (%p1200_p10), %s880_s9, 4294966976  ;;  %s900_s11 = scalar_lea.sflag [#allocation13], %s879_s18 }
 0x126   : > { %1568 = dma.done.wait (%p1200_p10), %s900_s11, 288  }
 0x127   : > { %1570 = vsyncadd (%p1200_p10), %s900_s11, 4294967008  ;;  %s31_s29 = sadd.s32 1, %s1593_s29   ;;  %s2203_s24 = smov %s1577_s25 }
 0x128   : > { %p28_p0 = scmp.ge.s32.totalorder %s31_s29, 4   ;;  %s2204_s25 = smov %s1581_s26 }
 0x129   : > { %s2205_s26 = smov %s1697_s14  ;;  %s2206_s27 = smov %s1589_s28 }
 0x12a   : > { %s2207_s28 = smov %s2209_s30  ;;  %30 = sbr.rel (!%p28_p0) target bundleno = 15 (0xf), region = 157 }
 0x12f   :  { %916 = vsyncpa [#allocation3], 1 }
 0x130   :  { %918 = vsyncpa [#allocation3 + $0x1], 1 }
 0x131   :  { %919 = vsyncpa [#allocation6], 1 }
 0x132   :  { %920 = vsyncpa [#allocation4], 1 }
 0x133   :  { %922 = vsyncpa [#allocation4 + $0x1], 1 }
 0x134   :  { %923 = vsyncpa [#allocation10], 1 }
 0x135   :  { %925 = vsyncpa [#allocation10 + $0x1], 1 }
 0x136   :  { %926 = vsyncpa [#allocation13], 1 }
 0x137   :  { %928 = vsyncpa [#allocation13 + $0x1], 1 }

</bundles_post_ra>
